<compile_context>
chip_gen: v5e
topology: v5e:2x2
jax: 0.10.0
libtpu: 0.0.40
codegen_flags: <defaults>
</compile_context>

<pallas_src>
import jax
import jax.numpy as jnp
from jax.experimental import pallas as pl
from jax.experimental.pallas import tpu as pltpu


def _interp_matrix(n_in: int, n_out: int, dtype=jnp.float32) -> jnp.ndarray:
    """Row-interpolation matrix A (n_out, n_in): bilinear, align_corners=True."""
    if n_out == 1:
        src = jnp.zeros((1,), dtype=jnp.float32)
    else:
        src = jnp.arange(n_out, dtype=jnp.float32) * (n_in - 1) / (n_out - 1)
    i0 = jnp.clip(jnp.floor(src).astype(jnp.int32), 0, n_in - 1)
    i1 = jnp.clip(i0 + 1, 0, n_in - 1)
    frac = src - i0.astype(jnp.float32)
    cols = jnp.arange(n_in, dtype=jnp.int32)
    a = ((cols[None, :] == i0[:, None]).astype(jnp.float32) * (1.0 - frac)[:, None]
         + (cols[None, :] == i1[:, None]).astype(jnp.float32) * frac[:, None])
    return a.astype(dtype)


def _vmem_budget_and_limit():
    """Per-generation VMEM sizing (working-set budget, vmem_limit_bytes)."""
    cap = 64 << 20  # conservative default (v7x per-TC VMEM)
    try:
        info = pltpu.get_tpu_info()
        cap = int(getattr(info, "vmem_capacity_bytes", cap))
    except Exception:
        pass
    limit = min(cap - (16 << 20), 100 << 20)   # leave headroom for compiler scratch
    limit = max(limit, 32 << 20)
    budget = max((limit * 3) // 5, 16 << 20)   # v7x ~28 MiB, v5e/v6e ~60 MiB
    return budget, limit


# ---------------------------------------------------------------------------
# Fused path: one matmul with the Kronecker operator (small H*W).
# ---------------------------------------------------------------------------
def _fused_kernel(m_ref, x_ref, o_ref):
    # m_ref: (H*W, Hout*Wout) resident fused interp operator
    # x_ref: (TB, H*W) contiguous slices
    # o_ref: (TB, Hout*Wout)
    o_ref[...] = jnp.dot(x_ref[...], m_ref[...],
                         preferred_element_type=jnp.float32).astype(o_ref.dtype)


# ---------------------------------------------------------------------------
# Separable fallback: two batched matmuls (large H*W).
# ---------------------------------------------------------------------------
def _separable_kernel(ah_ref, awt_ref, x_ref, o_ref):
    # ah_ref : (Hout, Hin)   resident H-interp matrix
    # awt_ref: (Win, Wout)   resident transposed W-interp matrix
    # x_ref  : (TB, Hin, Win)
    # o_ref  : (TB, Hout, Wout)
    tb, hin, win = x_ref.shape
    hout = ah_ref.shape[0]
    wout = awt_ref.shape[1]
    awt_b = jnp.broadcast_to(awt_ref[...], (tb, win, wout))
    xw = jnp.einsum("bhw,bwp->bhp", x_ref[...], awt_b,
                    preferred_element_type=jnp.float32)         # (TB, Hin, Wout)
    ah_b = jnp.broadcast_to(ah_ref[...], (tb, hout, hin))
    out = jnp.einsum("boh,bhw->bow", ah_b, xw,
                     preferred_element_type=jnp.float32)        # (TB, Hout, Wout)
    o_ref[...] = out.astype(o_ref.dtype)


def bilinear_3d_upsample(x: jnp.ndarray) -> jnp.ndarray:
    """x: (N, C, D, H, W) -> (N, C, D, 2H, 2W), bilinear align_corners=True per D-slice."""
    n, c, d, h, w = x.shape
    h_out, w_out = 2 * h, 2 * w
    b = n * c * d
    hw, hw_out = h * w, h_out * w_out
    isz = jnp.dtype(x.dtype).itemsize

    a_h = _interp_matrix(h, h_out)          # (Hout, Hin)
    a_w = _interp_matrix(w, w_out)          # (Wout, Win)

    budget, vmem_limit = _vmem_budget_and_limit()

    # Fused operator stays HBM-bound on all gens (intensity ~0.4*H*W flop/byte,
    # below the v5e knee) and its (H*W, 4*H*W) matrix stays small in VMEM.
    use_fused = hw <= 512

    if use_fused:
        # M[h*W + w, o*Wout + p] = A_h[o, h] * A_w[p, w]
        m = jnp.kron(a_h.T, a_w.T)                               # (H*W, Hout*Wout)

        # VMEM sizing: double-buffered in/out blocks + resident (double-buffered)
        # operator + f32 pre-cast result. f32 temporaries counted at 4 B/elem.
        fixed = 2 * hw * hw_out * 4
        per_row = 2 * hw * isz + 2 * hw_out * isz + hw_out * 4
        tb = int(max(8, min((budget - fixed) // per_row, b, 2048)))
        tb = max(8, (tb // 8) * 8)                               # sublane-aligned block
        # Ensure >= 2 grid steps so both v7x TensorCores are used.
        if b > 8 and pl.cdiv(b, tb) < 2:
            tb = max(8, ((pl.cdiv(b, 2) + 7) // 8) * 8)
        b_padded = pl.cdiv(b, tb) * tb

        x2 = x.reshape(b, hw)                                    # contiguous, no transpose
        if b_padded != b:
            x2 = jnp.pad(x2, ((0, b_padded - b), (0, 0)))

        out2 = pl.pallas_call(
            _fused_kernel,
            out_shape=jax.ShapeDtypeStruct((b_padded, hw_out), x.dtype),
            grid_spec=pltpu.PrefetchScalarGridSpec(
                num_scalar_prefetch=0,
                grid=(b_padded // tb,),
                in_specs=[
                    pl.BlockSpec((hw, hw_out), lambda i: (0, 0)),   # fused operator (resident)
                    pl.BlockSpec((tb, hw), lambda i: (i, 0)),       # TB contiguous slices
                ],
                out_specs=pl.BlockSpec((tb, hw_out), lambda i: (i, 0)),
            ),
            compiler_params=pltpu.CompilerParams(
                dimension_semantics=("parallel",),
                vmem_limit_bytes=vmem_limit,
            ),
        )(m, x2)

        return out2[:b].reshape(n, c, d, h_out, w_out)           # pure reshape, no relayout

    # ----------------- separable fallback (large H*W) -----------------
    # TODO(synk): if a single slice's working set exceeds the VMEM budget
    # (very large H*W), tile the H axis as well instead of relying on tb=1.
    a_wt = a_w.T                                                 # (Win, Wout)
    per_row = (2 * h * w * isz + 2 * h_out * w_out * isz
               + 4 * (h * w_out + h_out * w_out + h_out * h + w * w_out))
    tb = int(max(1, min(budget // per_row, b, 1024)))
    if b > 1 and pl.cdiv(b, tb) < 2:
        tb = pl.cdiv(b, 2)
    b_padded = pl.cdiv(b, tb) * tb

    x3 = x.reshape(b, h, w)                                      # contiguous, no transpose
    if b_padded != b:
        x3 = jnp.pad(x3, ((0, b_padded - b), (0, 0), (0, 0)))

    out3 = pl.pallas_call(
        _separable_kernel,
        out_shape=jax.ShapeDtypeStruct((b_padded, h_out, w_out), x.dtype),
        grid_spec=pltpu.PrefetchScalarGridSpec(
            num_scalar_prefetch=0,
            grid=(b_padded // tb,),
            in_specs=[
                pl.BlockSpec((h_out, h), lambda i: (0, 0)),       # A_h (resident)
                pl.BlockSpec((w, w_out), lambda i: (0, 0)),       # A_w^T (resident)
                pl.BlockSpec((tb, h, w), lambda i: (i, 0, 0)),    # TB slices
            ],
            out_specs=pl.BlockSpec((tb, h_out, w_out), lambda i: (i, 0, 0)),
        ),
        compiler_params=pltpu.CompilerParams(
            dimension_semantics=("parallel",),
            vmem_limit_bytes=vmem_limit,
        ),
    )(a_h, a_wt, x3)

    return out3[:b].reshape(n, c, d, h_out, w_out)


def _reference(x: jnp.ndarray) -> jnp.ndarray:
    """Pure-JAX reference (separable formulation, highest precision)."""
    n, c, d, h, w = x.shape
    a_h = _interp_matrix(h, 2 * h)
    a_w = _interp_matrix(w, 2 * w)
    return jnp.einsum("oh,ncdhw,pw->ncdop", a_h, x, a_w,
                      precision=jax.lax.Precision.HIGHEST)


if __name__ == "__main__":
    # Small shapes consistent with a 5-D NCDHW input: N=2, C=4, D=3, H=W=16.
    key = jax.random.PRNGKey(0)
    x = jax.random.normal(key, (2, 4, 3, 16, 16), dtype=jnp.float32)

    out = bilinear_3d_upsample(x)
    out = jax.block_until_ready(out)

    ref = jax.block_until_ready(_reference(x))
    assert out.shape == (2, 4, 3, 32, 32), out.shape
    assert jnp.allclose(out, ref, atol=2e-5, rtol=2e-5), "mismatch vs reference"

    print("KERNEL_OK")
</pallas_src>

<mosaic_0001>
module attributes {stable_mosaic.version = 11 : i64} {
  func.func @_fused_kernel(%arg0: i32, %arg1: memref<256x1024xf32, #tpu.memory_space<vmem>>, %arg2: memref<16x256xf32, #tpu.memory_space<vmem>>, %arg3: memref<16x1024xf32, #tpu.memory_space<vmem>>) attributes {dimension_semantics = [#tpu.dimension_semantics<parallel>], iteration_bounds = array<i64: 2>, scalar_prefetch = 0 : i64, scratch_operands = 0 : i64, tpu.core_type = #tpu.core_type<tc>, window_params = [{pipeline_mode = #tpu.pipeline_mode<synchronous>, transform_indices = @transform_0, window_bounds = array<i64: 256, 1024>}, {transform_indices = @transform_1, window_bounds = array<i64: 16, 256>}, {transform_indices = @transform_2, window_bounds = array<i64: 16, 1024>}]} {
    %c0 = arith.constant 0 : index
    %c0_0 = arith.constant 0 : index
    %0 = vector.load %arg2[%c0, %c0_0] : memref<16x256xf32, #tpu.memory_space<vmem>>, vector<16x256xf32>
    %c0_1 = arith.constant 0 : index
    %c0_2 = arith.constant 0 : index
    %1 = vector.load %arg1[%c0_1, %c0_2] : memref<256x1024xf32, #tpu.memory_space<vmem>>, vector<256x1024xf32>
    %cst = arith.constant dense<0.000000e+00> : vector<16x1024xf32>
    %2 = tpu.matmul %0, %1, %cst {dimension_numbers = #tpu.dot_dimension_numbers<[1], [0], [0], [1], [0, 0, 1, 1], [], []>} : vector<16x256xf32>, vector<256x1024xf32>, vector<16x1024xf32> -> vector<16x1024xf32>
    %c0_3 = arith.constant 0 : index
    %c0_4 = arith.constant 0 : index
    %3 = vector.load %arg3[%c0_3, %c0_4] : memref<16x1024xf32, #tpu.memory_space<vmem>>, vector<16x1024xf32>
    tpu.vector_store %arg3[%c0_3, %c0_4], %2 {strides = array<i32>} : memref<16x1024xf32, #tpu.memory_space<vmem>>, vector<16x1024xf32>,
    return
  }
  func.func @transform_0(%arg0: i32) -> (i32, i32) {
    %c0_i32 = arith.constant 0 : i32
    %c0_i32_0 = arith.constant 0 : i32
    %c0_i32_1 = arith.constant 0 : i32
    return %c0_i32, %c0_i32_0 : i32, i32
  }
  func.func @transform_1(%arg0: i32) -> (i32, i32) {
    %c0_i32 = arith.constant 0 : i32
    %c0_i32_0 = arith.constant 0 : i32
    return %arg0, %c0_i32 : i32, i32
  }
  func.func @transform_2(%arg0: i32) -> (i32, i32) {
    %c0_i32 = arith.constant 0 : i32
    %c0_i32_0 = arith.constant 0 : i32
    return %arg0, %c0_i32 : i32, i32
  }
}

</mosaic_0001>

<bundles_post_ra>
// kernel: tpu_custom_call.1
= control target key start
LH: loop header
LB: loop body
LE: loop exit
PB: predicated region body
PF: predicated region fallthrough
CT: control target
= control target key end

     0   :  { %7 = vsyncpa [#allocation3], 0  ;;  %s1375_s0 = inlined_call_operand.hbm [shape: f32[256,1024], index: 0, kind: input, shape index: {}]   ;;  %s1376_s1 = inlined_call_operand.hbm [shape: f32[32,256], index: 1, kind: input, shape index: {}]   ;;  %s1377_s2 = inlined_call_operand.hbm [shape: f32[32,1024], index: 2, kind: output, shape index: {}]  }
   0x1   :  { %8 = vsyncpa [#allocation6], 0 }
   0x2   :  { %10 = vsyncpa [#allocation6 + $0x1], 0 }
   0x3   :  { %11 = vsyncpa [#allocation4], 0 }
   0x4   :  { %13 = vsyncpa [#allocation4 + $0x1], 0  ;;  %s1169_s9 = smov 0   ;;  %s1171_s10 = smov 0  }
   0x5   :  { %s1173_s11 = smov 0   ;;  %s1175_s12 = smov 0  }
   0x6 LB: > { %s1190_s13 = sadd.s32 4294967295, %s1145_s12   ;;  %s930_s14 = sadd.s32 4294967294, %s1145_s12   ;;  %s1145_s12 = sphi %s1175_s12, %s1387_s12   ;;  %s1141_s11 = sphi %s1173_s11, %s1386_s11   ;;  %s1137_s10 = sphi %s1171_s10, %s1385_s10   ;;  %s1133_s9 = sphi %s1169_s9, %s1384_s9  }
   0x7   : > { %p60_p0 = scmp.ne.s32.totalorder %s1137_s10, %s1133_s9  ;;  %p61_p1 = scmp.eq.s32.totalorder %s1190_s13, 0 }
   0x8   : > { %p84_p2 = scmp.eq.s32.totalorder %s1190_s13, 1  ;;  %p90_p3 = scmp.eq.s32.totalorder %s930_s14, 1 }
   0x9   : > { %p1199_p4 = por %p61_p1, %p60_p0  ;;  %p931_p5 = scmp.ge.s32.totalorder %s1145_s12, 1 }
   0xa   : > { %p1204_p6 = por %p90_p3, %p60_p0  ;;  %p97_p7 = scmp.lt.s32.totalorder %s1145_s12, 3 }
   0xb   : > { %s108_s19 = sshll.u32 %s1375_s0, 4  ;;  %s1147_s21 = smov [#allocation2]   ;;  %s109_s19 = int_to_ptr.hbm [resolvable:$true] %s108_s19 }
   0xc   : > { %p1212_p8 = pnand %p931_p5, %p97_p7  ;;  %s110_s22 = sshll.u32 %s1147_s21, 4  ;;  %s111_s22 = int_to_ptr.vmem [resolvable:$true] %s110_s22 }
   0xd   : > { %s1222_s23 = sadd.s32 1, %s1145_s12   ;;  %s1148_s24 = smov 1024  }
   0xe   : > { %p960_p9 = pneg %p1212_p8  ;;  %s1149_s25 = smov 64  }
   0xf   : > { %s44_s26 = ssub.s32 %s1145_s12, %s1222_s23  ;;  %s47_s27 = sadd.s32 1, %s1141_s11 }
  0x10   : > { %p961_p10 = pnand %p960_p9, %p61_p1  ;;  %p45_p12 = scmp.eq.s32.totalorder %s44_s26, 0 }
  0x11   : > { %p54_p13 = scmp.ne.s32.totalorder %s1141_s11, %s1137_s10  ;;  %p55_p0 = scmp.eq.s32.totalorder %s1145_s12, 0 }
  0x12   : > { %963 = dma.hbm_to_vmem [thread:$0]  (!%p961_p10), %s109_s19, 32768, %s111_s22, [#allocation3], %s1148_s24, %s1148_s24, %s1149_s25  }
  0x13   : > { %p973_p3 = scmp.lt.s32.totalorder %s1145_s12, 2  ;;  %p56_p5 = por %p55_p0, %p54_p13 }
  0x14   : > { %s1232_s28 = scalar_select %p45_p12, %s1141_s11, %s47_s27  }
  0x15   : > { %p1236_p7 = por %p84_p2, %p54_p13  ;;  %s124_s30 = sand.u32 1, %s1141_s11  }
  0x16   : > { %s949_s3 = sshll.u32 %s1145_s12, 5  ;;  %s934_s4 = sshll.u32 %s124_s30, 5 }
  0x17   : > { %s134_s7 = scalar_lea.hbm %s1376_s1, %s949_s3  ;;  %s128_s14 = scalar_lea.vmem [#allocation5], %s934_s4 }
  0x18   : > { %s135_s8 = sshll.u32 %s134_s7, 4  ;;  %s137_s17 = sshll.u32 %s128_s14, 4  ;;  %s136_s8 = int_to_ptr.hbm [resolvable:$true] %s135_s8  ;;  %s138_s17 = int_to_ptr.vmem [resolvable:$true] %s137_s17 }
  0x19   : > { %p1247_p9 = pnand %p973_p3, %p56_p5  ;;  %s125_s19 = scalar_lea.sflag [#allocation6], %s124_s30 }
  0x1a   : > { %s1045_s21 = sshra.s32 %s136_s8, 4  ;;  %s1052_s26 = scalar_lea.hbm %s1376_s1, 64  ;;  %s1046_s21 = int_to_ptr.hbm [resolvable:$true] %s1045_s21 }
  0x1b   : > { %s1047_s22 = scalar_lea.hbm %s1046_s21, 32  ;;  %p1049_p10 = pneg %p1247_p9 }
  0x1c   : > { %p1048_p2 = scmp.ne.s32.totalorder %s1046_s21, %s1047_s22  ;;  %p1053_p0 = scmp.lt.s32.totalorder %s1046_s21, %s1376_s1 }
  0x1d   : > { %p1054_p3 = scmp.lt.s32.totalorder %s1052_s26, %s1047_s22 }
  0x1e   : > { %p1050_p12 = pnand %p1049_p10, %p1048_p2 }
  0x1f   : > { %p1055_p5 = por %p1054_p3, %p1053_p0 }
  0x20   : > { %p1051_p13 = pneg %p1050_p12 }
  0x22   : > { %p1056_p11 = pnand %p1055_p5, %p1051_p13 }
  0x24   : > { %1059 = shalt.err (!%p1056_p11)
}
  0x25   : > { %s1150_s30 = smov 256   ;;  %s1151_s4 = smov 16  }
  0x26   : > { %967 = dma.hbm_to_vmem [thread:$0]  (!%p1247_p9), %s136_s8, 512, %s138_s17, %s125_s19, %s1150_s30, %s1150_s30, %s1151_s4  }
  0x27   : > { %149 = sbr.rel (%p1212_p8) target bundleno = 334 (0x14e), region = 28 }
  0x2c   : > { %1120 = dma.done.wait (%p61_p1), [#allocation3], 32768  }
  0x2d   : > { %1122 = vsyncadd (%p61_p1), [#allocation3], 4294934528  ;;  %s1268_s5 = sand.u32 1, %s1137_s10  }
  0x2e   : > { %s940_s6 = sshll.u32 %s1268_s5, 5  ;;  %s157_s7 = scalar_lea.sflag [#allocation6], %s1268_s5 }
  0x2f   : > { %s1272_s14 = scalar_lea.vmem [#allocation5], %s940_s6 }
  0x30   : > { %1124 = dma.done.wait (%p1199_p4), %s157_s7, 512  }
  0x31   : > { %1126 = vsyncadd (%p1199_p4), %s157_s7, 4294966784  ;;  %v309_v0 = vld [vmem:[#allocation2 + $0x3c8] sm:$0xff]  ;;  %v308_v6 = vld [vmem:[#allocation2 + $0x3c0] sm:$0xff]  ;;  %s941_s15 = sshll.u32 %s1268_s5, 7  ;;  %s951_s8 = sshll.u32 %s1190_s13, 7 }
  0x32   : > { %v437_v1 = vld [vmem:[#allocation2 + $0x7c8] sm:$0xff]  ;;  %490 = vmatpush.msra.mxu2 %v309_v0  ;;  %v436_v7 = vld [vmem:[#allocation2 + $0x7c0] sm:$0xff]  ;;  %444 = vmatpush.msra.mxu0 %v308_v6  ;;  %v311_v60 = vld [vmem:[#allocation2 + $0x3d8] sm:$0xff]  ;;  %s1323_s20 = scalar_lea.vmem [#allocation7], %s941_s15  ;;  %s841_s19 = scalar_lea.hbm %s1377_s2, %s951_s8 }
  0x33   : > { %v301_v2 = vld [vmem:[#allocation2 + $0x388] sm:$0xff]  ;;  %513 = vmatpush.msra.mxu3 %v437_v1  ;;  %v300_v8 = vld [vmem:[#allocation2 + $0x380] sm:$0xff]  ;;  %467 = vmatpush.msra.mxu1 %v436_v7  ;;  %v439_v61 = vld [vmem:[#allocation2 + $0x7d8] sm:$0xff]  ;;  %s842_s21 = sshll.u32 %s1323_s20, 4  ;;  %s844_s22 = sshll.u32 %s841_s19, 4  ;;  %s843_s21 = int_to_ptr.vmem [resolvable:$true] %s842_s21  ;;  %s845_s22 = int_to_ptr.hbm [resolvable:$true] %s844_s22 }
  0x34   : > { %v429_v3 = vld [vmem:[#allocation2 + $0x788] sm:$0xff]  ;;  %491 = vmatpush.msra.mxu2 %v301_v2  ;;  %v428_v9 = vld [vmem:[#allocation2 + $0x780] sm:$0xff]  ;;  %445 = vmatpush.msra.mxu0 %v300_v8  ;;  %v303_v0 = vld [vmem:[#allocation2 + $0x398] sm:$0xff]  ;;  %s829_s13 = scalar_lea.sflag [#allocation4], %s1268_s5  ;;  %s1089_s24 = sshra.s32 %s845_s22, 4  ;;  %s1090_s24 = int_to_ptr.hbm [resolvable:$true] %s1089_s24 }
  0x35   : > { %v293_v4 = vld [vmem:[#allocation2 + $0x348] sm:$0xff]  ;;  %514 = vmatpush.msra.mxu3 %v429_v3  ;;  %v292_v12 = vld [vmem:[#allocation2 + $0x340] sm:$0xff]  ;;  %468 = vmatpush.msra.mxu1 %v428_v9  ;;  %v431_v1 = vld [vmem:[#allocation2 + $0x798] sm:$0xff]  ;;  %s1091_s25 = scalar_lea.hbm %s1090_s24, 128  ;;  %s1095_s3 = scalar_lea.hbm %s1377_s2, 256 }
  0x36   : > { %v421_v5 = vld [vmem:[#allocation2 + $0x748] sm:$0xff]  ;;  %492 = vmatpush.msra.mxu2 %v293_v4  ;;  %v420_v13 = vld [vmem:[#allocation2 + $0x740] sm:$0xff]  ;;  %446 = vmatpush.msra.mxu0 %v292_v12  ;;  %v295_v4 = vld [vmem:[#allocation2 + $0x358] sm:$0xff]  ;;  %p1092_p1 = scmp.ne.s32.totalorder %s1090_s24, %s1091_s25  ;;  %p1096_p11 = scmp.lt.s32.totalorder %s1090_s24, %s1377_s2 }
  0x37   : > { %v285_v10 = vld [vmem:[#allocation2 + $0x308] sm:$0xff]  ;;  %515 = vmatpush.msra.mxu3 %v421_v5  ;;  %v284_v16 = vld [vmem:[#allocation2 + $0x300] sm:$0xff]  ;;  %469 = vmatpush.msra.mxu1 %v420_v13  ;;  %v423_v5 = vld [vmem:[#allocation2 + $0x758] sm:$0xff]  ;;  %p1097_p9 = scmp.lt.s32.totalorder %s1095_s3, %s1091_s25 }
  0x38   : > { %v413_v11 = vld [vmem:[#allocation2 + $0x708] sm:$0xff]  ;;  %493 = vmatpush.msra.mxu2 %v285_v10  ;;  %v412_v17 = vld [vmem:[#allocation2 + $0x700] sm:$0xff]  ;;  %447 = vmatpush.msra.mxu0 %v284_v16  ;;  %v310_v6 = vld [vmem:[#allocation2 + $0x3d0] sm:$0xff]  ;;  %p1093_p4 = pnand %p1092_p1, %p1236_p7 }
  0x39   : > { %v277_v14 = vld [vmem:[#allocation2 + $0x2c8] sm:$0xff]  ;;  %516 = vmatpush.msra.mxu3 %v413_v11  ;;  %v276_v20 = vld [vmem:[#allocation2 + $0x2c0] sm:$0xff]  ;;  %470 = vmatpush.msra.mxu1 %v412_v17  ;;  %v438_v7 = vld [vmem:[#allocation2 + $0x7d0] sm:$0xff]  ;;  %p1098_p2 = por %p1097_p9, %p1096_p11 }
  0x3a   : > { %v405_v15 = vld [vmem:[#allocation2 + $0x6c8] sm:$0xff]  ;;  %494 = vmatpush.msra.mxu2 %v277_v14  ;;  %v404_v21 = vld [vmem:[#allocation2 + $0x6c0] sm:$0xff]  ;;  %448 = vmatpush.msra.mxu0 %v276_v20  ;;  %v287_v8 = vld [vmem:[#allocation2 + $0x318] sm:$0xff]  ;;  %p1094_p8 = pneg %p1093_p4 }
  0x3b   : > { %v269_v18 = vld [vmem:[#allocation2 + $0x288] sm:$0xff]  ;;  %517 = vmatpush.msra.mxu3 %v405_v15  ;;  %v268_v24 = vld [vmem:[#allocation2 + $0x280] sm:$0xff]  ;;  %471 = vmatpush.msra.mxu1 %v404_v21  ;;  %v415_v9 = vld [vmem:[#allocation2 + $0x718] sm:$0xff] }
  0x3c   : > { %v397_v19 = vld [vmem:[#allocation2 + $0x688] sm:$0xff]  ;;  %495 = vmatpush.msra.mxu2 %v269_v18  ;;  %v396_v25 = vld [vmem:[#allocation2 + $0x680] sm:$0xff]  ;;  %449 = vmatpush.msra.mxu0 %v268_v24  ;;  %v302_v10 = vld [vmem:[#allocation2 + $0x390] sm:$0xff]  ;;  %p1099_p10 = pnand %p1098_p2, %p1094_p8 }
  0x3d   : > { %v261_v22 = vld [vmem:[#allocation2 + $0x248] sm:$0xff]  ;;  %518 = vmatpush.msra.mxu3 %v397_v19  ;;  %v260_v28 = vld [vmem:[#allocation2 + $0x240] sm:$0xff]  ;;  %472 = vmatpush.msra.mxu1 %v396_v25  ;;  %v430_v11 = vld [vmem:[#allocation2 + $0x790] sm:$0xff] }
  0x3e   : > { %v389_v23 = vld [vmem:[#allocation2 + $0x648] sm:$0xff]  ;;  %496 = vmatpush.msra.mxu2 %v261_v22  ;;  %v388_v29 = vld [vmem:[#allocation2 + $0x640] sm:$0xff]  ;;  %450 = vmatpush.msra.mxu0 %v260_v28  ;;  %v279_v12 = vld [vmem:[#allocation2 + $0x2d8] sm:$0xff] }
  0x3f   : > { %v253_v26 = vld [vmem:[#allocation2 + $0x208] sm:$0xff]  ;;  %519 = vmatpush.msra.mxu3 %v389_v23  ;;  %v252_v32 = vld [vmem:[#allocation2 + $0x200] sm:$0xff]  ;;  %473 = vmatpush.msra.mxu1 %v388_v29  ;;  %v407_v13 = vld [vmem:[#allocation2 + $0x6d8] sm:$0xff] }
  0x40   : > { %v381_v27 = vld [vmem:[#allocation2 + $0x608] sm:$0xff]  ;;  %497 = vmatpush.msra.mxu2 %v253_v26  ;;  %v380_v33 = vld [vmem:[#allocation2 + $0x600] sm:$0xff]  ;;  %451 = vmatpush.msra.mxu0 %v252_v32  ;;  %v294_v14 = vld [vmem:[#allocation2 + $0x350] sm:$0xff] }
  0x41   : > { %v245_v30 = vld [vmem:[#allocation2 + $0x1c8] sm:$0xff]  ;;  %520 = vmatpush.msra.mxu3 %v381_v27  ;;  %v244_v36 = vld [vmem:[#allocation2 + $0x1c0] sm:$0xff]  ;;  %474 = vmatpush.msra.mxu1 %v380_v33  ;;  %v422_v15 = vld [vmem:[#allocation2 + $0x750] sm:$0xff] }
  0x42   : > { %v373_v31 = vld [vmem:[#allocation2 + $0x5c8] sm:$0xff]  ;;  %498 = vmatpush.msra.mxu2 %v245_v30  ;;  %v372_v37 = vld [vmem:[#allocation2 + $0x5c0] sm:$0xff]  ;;  %452 = vmatpush.msra.mxu0 %v244_v36  ;;  %v271_v16 = vld [vmem:[#allocation2 + $0x298] sm:$0xff] }
  0x43   : > { %v237_v34 = vld [vmem:[#allocation2 + $0x188] sm:$0xff]  ;;  %521 = vmatpush.msra.mxu3 %v373_v31  ;;  %v236_v40 = vld [vmem:[#allocation2 + $0x180] sm:$0xff]  ;;  %475 = vmatpush.msra.mxu1 %v372_v37  ;;  %v399_v17 = vld [vmem:[#allocation2 + $0x698] sm:$0xff] }
  0x44   : > { %v365_v35 = vld [vmem:[#allocation2 + $0x588] sm:$0xff]  ;;  %499 = vmatpush.msra.mxu2 %v237_v34  ;;  %v364_v41 = vld [vmem:[#allocation2 + $0x580] sm:$0xff]  ;;  %453 = vmatpush.msra.mxu0 %v236_v40  ;;  %v286_v18 = vld [vmem:[#allocation2 + $0x310] sm:$0xff] }
  0x45   : > { %v229_v38 = vld [vmem:[#allocation2 + $0x148] sm:$0xff]  ;;  %522 = vmatpush.msra.mxu3 %v365_v35  ;;  %v228_v44 = vld [vmem:[#allocation2 + $0x140] sm:$0xff]  ;;  %476 = vmatpush.msra.mxu1 %v364_v41  ;;  %v414_v19 = vld [vmem:[#allocation2 + $0x710] sm:$0xff] }
  0x46   : > { %v357_v39 = vld [vmem:[#allocation2 + $0x548] sm:$0xff]  ;;  %500 = vmatpush.msra.mxu2 %v229_v38  ;;  %v356_v45 = vld [vmem:[#allocation2 + $0x540] sm:$0xff]  ;;  %454 = vmatpush.msra.mxu0 %v228_v44  ;;  %v263_v20 = vld [vmem:[#allocation2 + $0x258] sm:$0xff] }
  0x47   : > { %v221_v42 = vld [vmem:[#allocation2 + $0x108] sm:$0xff]  ;;  %523 = vmatpush.msra.mxu3 %v357_v39  ;;  %v220_v48 = vld [vmem:[#allocation2 + $0x100] sm:$0xff]  ;;  %477 = vmatpush.msra.mxu1 %v356_v45  ;;  %v391_v21 = vld [vmem:[#allocation2 + $0x658] sm:$0xff] }
  0x48   : > { %v349_v43 = vld [vmem:[#allocation2 + $0x508] sm:$0xff]  ;;  %501 = vmatpush.msra.mxu2 %v221_v42  ;;  %v348_v49 = vld [vmem:[#allocation2 + $0x500] sm:$0xff]  ;;  %455 = vmatpush.msra.mxu0 %v220_v48  ;;  %v278_v22 = vld [vmem:[#allocation2 + $0x2d0] sm:$0xff] }
  0x49   : > { %v213_v46 = vld [vmem:[#allocation2 + $0xc8] sm:$0xff]  ;;  %524 = vmatpush.msra.mxu3 %v349_v43  ;;  %v212_v52 = vld [vmem:[#allocation2 + $0xc0] sm:$0xff]  ;;  %478 = vmatpush.msra.mxu1 %v348_v49  ;;  %v406_v23 = vld [vmem:[#allocation2 + $0x6d0] sm:$0xff] }
  0x4a   : > { %v341_v47 = vld [vmem:[#allocation2 + $0x4c8] sm:$0xff]  ;;  %502 = vmatpush.msra.mxu2 %v213_v46  ;;  %v340_v53 = vld [vmem:[#allocation2 + $0x4c0] sm:$0xff]  ;;  %456 = vmatpush.msra.mxu0 %v212_v52  ;;  %v255_v24 = vld [vmem:[#allocation2 + $0x218] sm:$0xff] }
  0x4b   : > { %v205_v50 = vld [vmem:[#allocation2 + $0x88] sm:$0xff]  ;;  %525 = vmatpush.msra.mxu3 %v341_v47  ;;  %v204_v56 = vld [vmem:[#allocation2 + $0x80] sm:$0xff]  ;;  %479 = vmatpush.msra.mxu1 %v340_v53  ;;  %v383_v25 = vld [vmem:[#allocation2 + $0x618] sm:$0xff] }
  0x4c   : > { %v333_v51 = vld [vmem:[#allocation2 + $0x488] sm:$0xff]  ;;  %503 = vmatpush.msra.mxu2 %v205_v50  ;;  %v332_v57 = vld [vmem:[#allocation2 + $0x480] sm:$0xff]  ;;  %457 = vmatpush.msra.mxu0 %v204_v56  ;;  %v270_v26 = vld [vmem:[#allocation2 + $0x290] sm:$0xff] }
  0x4d   : > { %v197_v54 = vld [vmem:[#allocation2 + $0x48] sm:$0xff]  ;;  %526 = vmatpush.msra.mxu3 %v333_v51  ;;  %480 = vmatpush.msra.mxu1 %v332_v57  ;;  %v196_v62 = vld [vmem:[#allocation2 + $0x40] sm:$0xff]  ;;  %v398_v27 = vld [vmem:[#allocation2 + $0x690] sm:$0xff] }
  0x4e   : > { %v325_v55 = vld [vmem:[#allocation2 + $0x448] sm:$0xff]  ;;  %504 = vmatpush.msra.mxu2 %v197_v54  ;;  %v324_v63 = vld [vmem:[#allocation2 + $0x440] sm:$0xff]  ;;  %458 = vmatpush.msra.mxu0 %v196_v62  ;;  %v247_v28 = vld [vmem:[#allocation2 + $0x1d8] sm:$0xff] }
  0x4f   : > { %v189_v58 = vld [vmem:[#allocation2 + $0x8] sm:$0xff]  ;;  %527 = vmatpush.msra.mxu3 %v325_v55  ;;  %v188_v2 = vld [vmem:[#allocation2] sm:$0xff]  ;;  %481 = vmatpush.msra.mxu1 %v324_v63  ;;  %v375_v29 = vld [vmem:[#allocation2 + $0x5d8] sm:$0xff] }
  0x50   : > { %v317_v59 = vld [vmem:[#allocation2 + $0x408] sm:$0xff]  ;;  %505 = vmatpush.msra.mxu2 %v189_v58  ;;  %v316_v3 = vld [vmem:[#allocation2 + $0x400] sm:$0xff]  ;;  %459 = vmatpush.msra.mxu0 %v188_v2  ;;  %v262_v30 = vld [vmem:[#allocation2 + $0x250] sm:$0xff] }
  0x51   : > { %528 = vmatpush.msra.mxu3 %v317_v59  ;;  %482 = vmatpush.msra.mxu1 %v316_v3  ;;  %v390_v31 = vld [vmem:[#allocation2 + $0x650] sm:$0xff]  ;;  %v239_v32 = vld [vmem:[#allocation2 + $0x198] sm:$0xff]  ;;  %v1279_v58 = vld [vmem:[%s1272_s14] sm:$0xff] }
  0x52   : > { %582 = vmatpush.msrb.mxu2 %v311_v60  ;;  %536 = vmatpush.msrb.mxu0 %v310_v6  ;;  %v367_v33 = vld [vmem:[#allocation2 + $0x598] sm:$0xff]  ;;  %v254_v34 = vld [vmem:[#allocation2 + $0x210] sm:$0xff]  ;;  %v1282_v59 = vld [vmem:[%s1272_s14 + $0x8] sm:$0xff] }
  0x53   : > { %605 = vmatpush.msrb.mxu3 %v439_v61  ;;  %559 = vmatpush.msrb.mxu1 %v438_v7  ;;  %v382_v35 = vld [vmem:[#allocation2 + $0x610] sm:$0xff]  ;;  %v231_v36 = vld [vmem:[#allocation2 + $0x158] sm:$0xff]  ;;  %v313_v60 = vld [vmem:[#allocation2 + $0x3e8] sm:$0xff] }
  0x54   : > { %583 = vmatpush.msrb.mxu2 %v303_v0  ;;  %537 = vmatpush.msrb.mxu0 %v302_v10  ;;  %v359_v37 = vld [vmem:[#allocation2 + $0x558] sm:$0xff]  ;;  %v246_v38 = vld [vmem:[#allocation2 + $0x1d0] sm:$0xff]  ;;  %v441_v61 = vld [vmem:[#allocation2 + $0x7e8] sm:$0xff] }
  0x55   : > { %606 = vmatpush.msrb.mxu3 %v431_v1  ;;  %560 = vmatpush.msrb.mxu1 %v430_v11  ;;  %v374_v39 = vld [vmem:[#allocation2 + $0x5d0] sm:$0xff]  ;;  %v223_v40 = vld [vmem:[#allocation2 + $0x118] sm:$0xff]  ;;  %v305_v0 = vld [vmem:[#allocation2 + $0x3a8] sm:$0xff] }
  0x56   : > { %584 = vmatpush.msrb.mxu2 %v295_v4  ;;  %538 = vmatpush.msrb.mxu0 %v294_v14  ;;  %v351_v41 = vld [vmem:[#allocation2 + $0x518] sm:$0xff]  ;;  %v238_v42 = vld [vmem:[#allocation2 + $0x190] sm:$0xff]  ;;  %v433_v1 = vld [vmem:[#allocation2 + $0x7a8] sm:$0xff] }
  0x57   : > { %607 = vmatpush.msrb.mxu3 %v423_v5  ;;  %561 = vmatpush.msrb.mxu1 %v422_v15  ;;  %v366_v43 = vld [vmem:[#allocation2 + $0x590] sm:$0xff]  ;;  %v215_v44 = vld [vmem:[#allocation2 + $0xd8] sm:$0xff]  ;;  %v297_v4 = vld [vmem:[#allocation2 + $0x368] sm:$0xff] }
  0x58   : > { %585 = vmatpush.msrb.mxu2 %v287_v8  ;;  %539 = vmatpush.msrb.mxu0 %v286_v18  ;;  %v343_v45 = vld [vmem:[#allocation2 + $0x4d8] sm:$0xff]  ;;  %v230_v46 = vld [vmem:[#allocation2 + $0x150] sm:$0xff]  ;;  %v425_v5 = vld [vmem:[#allocation2 + $0x768] sm:$0xff] }
  0x59   : > { %608 = vmatpush.msrb.mxu3 %v415_v9  ;;  %562 = vmatpush.msrb.mxu1 %v414_v19  ;;  %v358_v47 = vld [vmem:[#allocation2 + $0x550] sm:$0xff]  ;;  %v207_v48 = vld [vmem:[#allocation2 + $0x98] sm:$0xff]  ;;  %v312_v8 = vld [vmem:[#allocation2 + $0x3e0] sm:$0xff] }
  0x5a   : > { %586 = vmatpush.msrb.mxu2 %v279_v12  ;;  %540 = vmatpush.msrb.mxu0 %v278_v22  ;;  %v335_v49 = vld [vmem:[#allocation2 + $0x498] sm:$0xff]  ;;  %v222_v50 = vld [vmem:[#allocation2 + $0x110] sm:$0xff]  ;;  %v440_v9 = vld [vmem:[#allocation2 + $0x7e0] sm:$0xff] }
  0x5b   : > { %609 = vmatpush.msrb.mxu3 %v407_v13  ;;  %563 = vmatpush.msrb.mxu1 %v406_v23  ;;  %v350_v51 = vld [vmem:[#allocation2 + $0x510] sm:$0xff]  ;;  %v199_v52 = vld [vmem:[#allocation2 + $0x58] sm:$0xff]  ;;  %v289_v10 = vld [vmem:[#allocation2 + $0x328] sm:$0xff] }
  0x5c   : > { %587 = vmatpush.msrb.mxu2 %v271_v16  ;;  %541 = vmatpush.msrb.mxu0 %v270_v26  ;;  %v327_v53 = vld [vmem:[#allocation2 + $0x458] sm:$0xff]  ;;  %v214_v54 = vld [vmem:[#allocation2 + $0xd0] sm:$0xff]  ;;  %v417_v11 = vld [vmem:[#allocation2 + $0x728] sm:$0xff] }
  0x5d   : > { %610 = vmatpush.msrb.mxu3 %v399_v17  ;;  %564 = vmatpush.msrb.mxu1 %v398_v27  ;;  %v342_v55 = vld [vmem:[#allocation2 + $0x4d0] sm:$0xff]  ;;  %v191_v56 = vld [vmem:[#allocation2 + $0x18] sm:$0xff]  ;;  %v304_v12 = vld [vmem:[#allocation2 + $0x3a0] sm:$0xff] }
  0x5e   : > { %588 = vmatpush.msrb.mxu2 %v263_v20  ;;  %542 = vmatpush.msrb.mxu0 %v262_v30  ;;  %v319_v57 = vld [vmem:[#allocation2 + $0x418] sm:$0xff]  ;;  %v206_v62 = vld [vmem:[#allocation2 + $0x90] sm:$0xff]  ;;  %v432_v13 = vld [vmem:[#allocation2 + $0x7a0] sm:$0xff] }
  0x5f   : > { %611 = vmatpush.msrb.mxu3 %v391_v21  ;;  %565 = vmatpush.msrb.mxu1 %v390_v31  ;;  %v334_v63 = vld [vmem:[#allocation2 + $0x490] sm:$0xff]  ;;  %v281_v14 = vld [vmem:[#allocation2 + $0x2e8] sm:$0xff]  ;;  %v296_v16 = vld [vmem:[#allocation2 + $0x360] sm:$0xff] }
  0x60   : > { %589 = vmatpush.msrb.mxu2 %v255_v24  ;;  %543 = vmatpush.msrb.mxu0 %v254_v34  ;;  %v198_v2 = vld [vmem:[#allocation2 + $0x50] sm:$0xff]  ;;  %v409_v15 = vld [vmem:[#allocation2 + $0x6e8] sm:$0xff]  ;;  %v424_v17 = vld [vmem:[#allocation2 + $0x760] sm:$0xff] }
  0x61   : > { %612 = vmatpush.msrb.mxu3 %v383_v25  ;;  %566 = vmatpush.msrb.mxu1 %v382_v35  ;;  %v326_v3 = vld [vmem:[#allocation2 + $0x450] sm:$0xff]  ;;  %v273_v18 = vld [vmem:[#allocation2 + $0x2a8] sm:$0xff]  ;;  %v288_v20 = vld [vmem:[#allocation2 + $0x320] sm:$0xff] }
  0x62   : > { %590 = vmatpush.msrb.mxu2 %v247_v28  ;;  %544 = vmatpush.msrb.mxu0 %v246_v38  ;;  %v190_v6 = vld [vmem:[#allocation2 + $0x10] sm:$0xff]  ;;  %v401_v19 = vld [vmem:[#allocation2 + $0x6a8] sm:$0xff]  ;;  %v416_v21 = vld [vmem:[#allocation2 + $0x720] sm:$0xff] }
  0x63   : > { %613 = vmatpush.msrb.mxu3 %v375_v29  ;;  %567 = vmatpush.msrb.mxu1 %v374_v39  ;;  %v318_v7 = vld [vmem:[#allocation2 + $0x410] sm:$0xff]  ;;  %v265_v22 = vld [vmem:[#allocation2 + $0x268] sm:$0xff]  ;;  %v280_v24 = vld [vmem:[#allocation2 + $0x2e0] sm:$0xff] }
  0x64   : > { %591 = vmatpush.msrb.mxu2 %v239_v32  ;;  %545 = vmatpush.msrb.mxu0 %v238_v42  ;;  %v393_v23 = vld [vmem:[#allocation2 + $0x668] sm:$0xff]  ;;  %v408_v25 = vld [vmem:[#allocation2 + $0x6e0] sm:$0xff] }
  0x65   : > { %614 = vmatpush.msrb.mxu3 %v367_v33  ;;  %568 = vmatpush.msrb.mxu1 %v366_v43  ;;  %v257_v26 = vld [vmem:[#allocation2 + $0x228] sm:$0xff]  ;;  %v272_v28 = vld [vmem:[#allocation2 + $0x2a0] sm:$0xff] }
  0x66   : > { %592 = vmatpush.msrb.mxu2 %v231_v36  ;;  %546 = vmatpush.msrb.mxu0 %v230_v46  ;;  %v385_v27 = vld [vmem:[#allocation2 + $0x628] sm:$0xff]  ;;  %v400_v29 = vld [vmem:[#allocation2 + $0x6a0] sm:$0xff] }
  0x67   : > { %615 = vmatpush.msrb.mxu3 %v359_v37  ;;  %569 = vmatpush.msrb.mxu1 %v358_v47  ;;  %v249_v30 = vld [vmem:[#allocation2 + $0x1e8] sm:$0xff]  ;;  %v264_v32 = vld [vmem:[#allocation2 + $0x260] sm:$0xff] }
  0x68   : > { %593 = vmatpush.msrb.mxu2 %v223_v40  ;;  %547 = vmatpush.msrb.mxu0 %v222_v50  ;;  %v377_v31 = vld [vmem:[#allocation2 + $0x5e8] sm:$0xff]  ;;  %v392_v33 = vld [vmem:[#allocation2 + $0x660] sm:$0xff]  ;;  %v1289_v40 = vld [vmem:[%s1272_s14 + $0x10] sm:$0xff] }
  0x69   : > { %616 = vmatpush.msrb.mxu3 %v351_v41  ;;  %570 = vmatpush.msrb.mxu1 %v350_v51  ;;  %v241_v34 = vld [vmem:[#allocation2 + $0x1a8] sm:$0xff]  ;;  %v256_v36 = vld [vmem:[#allocation2 + $0x220] sm:$0xff]  ;;  %v1292_v41 = vld [vmem:[%s1272_s14 + $0x18] sm:$0xff] }
  0x6a   : > { %594 = vmatpush.msrb.mxu2 %v215_v44  ;;  %548 = vmatpush.msrb.mxu0 %v214_v54  ;;  %v369_v35 = vld [vmem:[#allocation2 + $0x5a8] sm:$0xff]  ;;  %v384_v37 = vld [vmem:[#allocation2 + $0x620] sm:$0xff] }
  0x6b   : > { %617 = vmatpush.msrb.mxu3 %v343_v45  ;;  %571 = vmatpush.msrb.mxu1 %v342_v55  ;;  %v233_v38 = vld [vmem:[#allocation2 + $0x168] sm:$0xff]  ;;  %v248_v42 = vld [vmem:[#allocation2 + $0x1e0] sm:$0xff] }
  0x6c   : > { %595 = vmatpush.msrb.mxu2 %v207_v48  ;;  %529 = vmatmul.f32.vlgmr.msra.gmra.mxu3 %v1282_v59  ;;  %v361_v39 = vld [vmem:[#allocation2 + $0x568] sm:$0xff]  ;;  %v376_v43 = vld [vmem:[#allocation2 + $0x5e0] sm:$0xff] }
  0x6d   : > { %618 = vmatpush.msrb.mxu3 %v335_v49  ;;  %506 = vmatmul.f32.vlgmr.msra.gmra.mxu2 %v1279_v58  ;;  %v225_v44 = vld [vmem:[#allocation2 + $0x128] sm:$0xff]  ;;  %v240_v46 = vld [vmem:[#allocation2 + $0x1a0] sm:$0xff] }
  0x6e   : > { %596 = vmatpush.msrb.mxu2 %v199_v52  ;;  %549 = vmatpush.msrb.mxu0 %v206_v62  ;;  %v353_v45 = vld [vmem:[#allocation2 + $0x528] sm:$0xff]  ;;  %v368_v47 = vld [vmem:[#allocation2 + $0x5a0] sm:$0xff] }
  0x6f   : > { %619 = vmatpush.msrb.mxu3 %v327_v53  ;;  %572 = vmatpush.msrb.mxu1 %v334_v63  ;;  %v217_v48 = vld [vmem:[#allocation2 + $0xe8] sm:$0xff]  ;;  %v232_v50 = vld [vmem:[#allocation2 + $0x160] sm:$0xff] }
  0x70   : > { %597 = vmatpush.msrb.mxu2 %v191_v56  ;;  %550 = vmatpush.msrb.mxu0 %v198_v2  ;;  %v345_v49 = vld [vmem:[#allocation2 + $0x4e8] sm:$0xff]  ;;  %v360_v51 = vld [vmem:[#allocation2 + $0x560] sm:$0xff] }
  0x71   : > { %620 = vmatpush.msrb.mxu3 %v319_v57  ;;  %573 = vmatpush.msrb.mxu1 %v326_v3  ;;  %v209_v52 = vld [vmem:[#allocation2 + $0xa8] sm:$0xff]  ;;  %v224_v54 = vld [vmem:[#allocation2 + $0x120] sm:$0xff] }
  0x72   : > { %674 = vmatpush.msra.mxu2 %v313_v60  ;;  %551 = vmatpush.msrb.mxu0 %v190_v6  ;;  %v337_v53 = vld [vmem:[#allocation2 + $0x4a8] sm:$0xff]  ;;  %v352_v55 = vld [vmem:[#allocation2 + $0x520] sm:$0xff] }
  0x73   : > { %697 = vmatpush.msra.mxu3 %v441_v61  ;;  %574 = vmatpush.msrb.mxu1 %v318_v7  ;;  %v201_v56 = vld [vmem:[#allocation2 + $0x68] sm:$0xff]  ;;  %v216_v60 = vld [vmem:[#allocation2 + $0xe0] sm:$0xff] }
  0x74   : > { %675 = vmatpush.msra.mxu2 %v305_v0  ;;  %460 = vmatmul.f32.vlgmr.msra.gmra.mxu0 %v1279_v58  ;;  %v329_v57 = vld [vmem:[#allocation2 + $0x468] sm:$0xff]  ;;  %v344_v61 = vld [vmem:[#allocation2 + $0x4e0] sm:$0xff]  ;;  %v315_v0 = vld [vmem:[#allocation2 + $0x3f8] sm:$0xff] }
  0x75   : > { %698 = vmatpush.msra.mxu3 %v433_v1  ;;  %483 = vmatmul.f32.vlgmr.msra.gmra.mxu1 %v1282_v59  ;;  %v193_v62 = vld [vmem:[#allocation2 + $0x28] sm:$0xff]  ;;  %v443_v1 = vld [vmem:[#allocation2 + $0x7f8] sm:$0xff]  ;;  %v208_v2 = vld [vmem:[#allocation2 + $0xa0] sm:$0xff] }
  0x76   : > { %676 = vmatpush.msra.mxu2 %v297_v4  ;;  %628 = vmatpush.msra.mxu0 %v312_v8  ;;  %v321_v63 = vld [vmem:[#allocation2 + $0x428] sm:$0xff]  ;;  %v336_v3 = vld [vmem:[#allocation2 + $0x4a0] sm:$0xff]  ;;  %v307_v4 = vld [vmem:[#allocation2 + $0x3b8] sm:$0xff] }
  0x77   : > { %699 = vmatpush.msra.mxu3 %v425_v5  ;;  %651 = vmatpush.msra.mxu1 %v440_v9  ;;  %v435_v5 = vld [vmem:[#allocation2 + $0x7b8] sm:$0xff]  ;;  %v200_v6 = vld [vmem:[#allocation2 + $0x60] sm:$0xff] }
  0x78   : > { %677 = vmatpush.msra.mxu2 %v289_v10  ;;  %629 = vmatpush.msra.mxu0 %v304_v12  ;;  %v328_v7 = vld [vmem:[#allocation2 + $0x460] sm:$0xff]  ;;  %v299_v8 = vld [vmem:[#allocation2 + $0x378] sm:$0xff]  ;;  %v314_v12 = vld [vmem:[#allocation2 + $0x3f0] sm:$0xff] }
  0x79   : > { %700 = vmatpush.msra.mxu3 %v417_v11  ;;  %652 = vmatpush.msra.mxu1 %v432_v13  ;;  %v427_v9 = vld [vmem:[#allocation2 + $0x778] sm:$0xff]  ;;  %v192_v10 = vld [vmem:[#allocation2 + $0x20] sm:$0xff]  ;;  %v442_v13 = vld [vmem:[#allocation2 + $0x7f0] sm:$0xff] }
  0x7a   : > { %678 = vmatpush.msra.mxu2 %v281_v14  ;;  %630 = vmatpush.msra.mxu0 %v296_v16  ;;  %v320_v11 = vld [vmem:[#allocation2 + $0x420] sm:$0xff]  ;;  %v291_v14 = vld [vmem:[#allocation2 + $0x338] sm:$0xff]  ;;  %v306_v16 = vld [vmem:[#allocation2 + $0x3b0] sm:$0xff] }
  0x7b   : > { %701 = vmatpush.msra.mxu3 %v409_v15  ;;  %653 = vmatpush.msra.mxu1 %v424_v17  ;;  %v419_v15 = vld [vmem:[#allocation2 + $0x738] sm:$0xff]  ;;  %v434_v17 = vld [vmem:[#allocation2 + $0x7b0] sm:$0xff] }
  0x7c   : > { %679 = vmatpush.msra.mxu2 %v273_v18  ;;  %631 = vmatpush.msra.mxu0 %v288_v20  ;;  %v283_v18 = vld [vmem:[#allocation2 + $0x2f8] sm:$0xff]  ;;  %v298_v20 = vld [vmem:[#allocation2 + $0x370] sm:$0xff] }
  0x7d   : > { %702 = vmatpush.msra.mxu3 %v401_v19  ;;  %654 = vmatpush.msra.mxu1 %v416_v21  ;;  %v411_v19 = vld [vmem:[#allocation2 + $0x6f8] sm:$0xff]  ;;  %v426_v21 = vld [vmem:[#allocation2 + $0x770] sm:$0xff] }
  0x7e   : > { %680 = vmatpush.msra.mxu2 %v265_v22  ;;  %632 = vmatpush.msra.mxu0 %v280_v24  ;;  %v275_v22 = vld [vmem:[#allocation2 + $0x2b8] sm:$0xff]  ;;  %v290_v24 = vld [vmem:[#allocation2 + $0x330] sm:$0xff] }
  0x7f   : > { %703 = vmatpush.msra.mxu3 %v393_v23  ;;  %655 = vmatpush.msra.mxu1 %v408_v25  ;;  %v403_v23 = vld [vmem:[#allocation2 + $0x6b8] sm:$0xff]  ;;  %v418_v25 = vld [vmem:[#allocation2 + $0x730] sm:$0xff] }
  0x80   : > { %681 = vmatpush.msra.mxu2 %v257_v26  ;;  %633 = vmatpush.msra.mxu0 %v272_v28  ;;  %v267_v26 = vld [vmem:[#allocation2 + $0x278] sm:$0xff]  ;;  %v282_v28 = vld [vmem:[#allocation2 + $0x2f0] sm:$0xff] }
  0x81   : > { %704 = vmatpush.msra.mxu3 %v385_v27  ;;  %656 = vmatpush.msra.mxu1 %v400_v29  ;;  %v395_v27 = vld [vmem:[#allocation2 + $0x678] sm:$0xff]  ;;  %v410_v29 = vld [vmem:[#allocation2 + $0x6f0] sm:$0xff] }
  0x82   : > { %682 = vmatpush.msra.mxu2 %v249_v30  ;;  %634 = vmatpush.msra.mxu0 %v264_v32  ;;  %v259_v30 = vld [vmem:[#allocation2 + $0x238] sm:$0xff]  ;;  %v274_v32 = vld [vmem:[#allocation2 + $0x2b0] sm:$0xff] }
  0x83   : > { %705 = vmatpush.msra.mxu3 %v377_v31  ;;  %657 = vmatpush.msra.mxu1 %v392_v33  ;;  %v387_v31 = vld [vmem:[#allocation2 + $0x638] sm:$0xff]  ;;  %v402_v33 = vld [vmem:[#allocation2 + $0x6b0] sm:$0xff] }
  0x84   : > { %683 = vmatpush.msra.mxu2 %v241_v34  ;;  %635 = vmatpush.msra.mxu0 %v256_v36  ;;  %v251_v34 = vld [vmem:[#allocation2 + $0x1f8] sm:$0xff]  ;;  %v266_v36 = vld [vmem:[#allocation2 + $0x270] sm:$0xff] }
  0x85   : > { %706 = vmatpush.msra.mxu3 %v369_v35  ;;  %658 = vmatpush.msra.mxu1 %v384_v37  ;;  %v379_v35 = vld [vmem:[#allocation2 + $0x5f8] sm:$0xff]  ;;  %v394_v37 = vld [vmem:[#allocation2 + $0x670] sm:$0xff] }
  0x86   : > { %684 = vmatpush.msra.mxu2 %v233_v38  ;;  %532 = vmatmul.f32.gmra.mxu3 %v1292_v41  ;;  %v243_v38 = vld [vmem:[#allocation2 + $0x1b8] sm:$0xff] }
  0x87   : > { %707 = vmatpush.msra.mxu3 %v361_v39  ;;  %509 = vmatmul.f32.gmra.mxu2 %v1289_v40  ;;  %v371_v39 = vld [vmem:[#allocation2 + $0x5b8] sm:$0xff] }
  0x88   : > { %636 = vmatpush.msra.mxu0 %v248_v42  ;;  %659 = vmatpush.msra.mxu1 %v376_v43  ;;  %v258_v42 = vld [vmem:[#allocation2 + $0x230] sm:$0xff] }
  0x89   : > { %685 = vmatpush.msra.mxu2 %v225_v44  ;;  %708 = vmatpush.msra.mxu3 %v353_v45  ;;  %v386_v43 = vld [vmem:[#allocation2 + $0x630] sm:$0xff]  ;;  %v235_v44 = vld [vmem:[#allocation2 + $0x178] sm:$0xff] }
  0x8a   : > { %637 = vmatpush.msra.mxu0 %v240_v46  ;;  %660 = vmatpush.msra.mxu1 %v368_v47  ;;  %v363_v45 = vld [vmem:[#allocation2 + $0x578] sm:$0xff]  ;;  %v250_v46 = vld [vmem:[#allocation2 + $0x1f0] sm:$0xff] }
  0x8b   : > { %686 = vmatpush.msra.mxu2 %v217_v48  ;;  %709 = vmatpush.msra.mxu3 %v345_v49  ;;  %v378_v47 = vld [vmem:[#allocation2 + $0x5f0] sm:$0xff]  ;;  %v227_v48 = vld [vmem:[#allocation2 + $0x138] sm:$0xff] }
  0x8c   : > { %638 = vmatpush.msra.mxu0 %v232_v50  ;;  %661 = vmatpush.msra.mxu1 %v360_v51  ;;  %v355_v49 = vld [vmem:[#allocation2 + $0x538] sm:$0xff]  ;;  %v242_v50 = vld [vmem:[#allocation2 + $0x1b0] sm:$0xff] }
  0x8d   : > { %687 = vmatpush.msra.mxu2 %v209_v52  ;;  %710 = vmatpush.msra.mxu3 %v337_v53  ;;  %v370_v51 = vld [vmem:[#allocation2 + $0x5b0] sm:$0xff]  ;;  %v219_v52 = vld [vmem:[#allocation2 + $0xf8] sm:$0xff] }
  0x8e   : > { %463 = vmatmul.f32.gmra.mxu0 %v1289_v40  ;;  %486 = vmatmul.f32.gmra.mxu1 %v1292_v41  ;;  %v347_v53 = vld [vmem:[#allocation2 + $0x4f8] sm:$0xff] }
  0x8f   : > { %639 = vmatpush.msra.mxu0 %v224_v54  ;;  %662 = vmatpush.msra.mxu1 %v352_v55  ;;  %v234_v54 = vld [vmem:[#allocation2 + $0x170] sm:$0xff] }
  0x90   : > { %688 = vmatpush.msra.mxu2 %v201_v56  ;;  %711 = vmatpush.msra.mxu3 %v329_v57  ;;  %v362_v55 = vld [vmem:[#allocation2 + $0x570] sm:$0xff]  ;;  %v211_v56 = vld [vmem:[#allocation2 + $0xb8] sm:$0xff] }
  0x91   : > { %598 = vmatmul.f32.vlgmr.msrb.gmra.mxu2 %v1279_v58  ;;  %621 = vmatmul.f32.vlgmr.msrb.gmra.mxu3 %v1282_v59  ;;  %v339_v57 = vld [vmem:[#allocation2 + $0x4b8] sm:$0xff] }
  0x92   : > { %640 = vmatpush.msra.mxu0 %v216_v60  ;;  %663 = vmatpush.msra.mxu1 %v344_v61  ;;  %v226_v60 = vld [vmem:[#allocation2 + $0x130] sm:$0xff] }
  0x93   : > { %689 = vmatpush.msra.mxu2 %v193_v62  ;;  %712 = vmatpush.msra.mxu3 %v321_v63  ;;  %v354_v61 = vld [vmem:[#allocation2 + $0x530] sm:$0xff]  ;;  %v203_v62 = vld [vmem:[#allocation2 + $0x78] sm:$0xff] }
  0x94   : > { %641 = vmatpush.msra.mxu0 %v208_v2  ;;  %664 = vmatpush.msra.mxu1 %v336_v3  ;;  %v331_v63 = vld [vmem:[#allocation2 + $0x478] sm:$0xff] }
  0x95   : > { %766 = vmatpush.msrb.mxu2 %v315_v0  ;;  %789 = vmatpush.msrb.mxu3 %v443_v1  ;;  %v218_v0 = vld [vmem:[#allocation2 + $0xf0] sm:$0xff]  ;;  %v195_v2 = vld [vmem:[#allocation2 + $0x38] sm:$0xff] }
  0x96   : > { %642 = vmatpush.msra.mxu0 %v200_v6  ;;  %665 = vmatpush.msra.mxu1 %v328_v7  ;;  %v346_v1 = vld [vmem:[#allocation2 + $0x4f0] sm:$0xff]  ;;  %v323_v3 = vld [vmem:[#allocation2 + $0x438] sm:$0xff] }
  0x97   : > { %767 = vmatpush.msrb.mxu2 %v307_v4  ;;  %790 = vmatpush.msrb.mxu3 %v435_v5  ;;  %v210_v4 = vld [vmem:[#allocation2 + $0xb0] sm:$0xff] }
  0x98   : > { %552 = vmatmul.f32.vlgmr.msrb.gmra.mxu0 %v1279_v58  ;;  %575 = vmatmul.f32.vlgmr.msrb.gmra.mxu1 %v1282_v59  ;;  %v338_v5 = vld [vmem:[#allocation2 + $0x4b0] sm:$0xff] }
  0x99   : > { %768 = vmatpush.msrb.mxu2 %v299_v8  ;;  %791 = vmatpush.msrb.mxu3 %v427_v9  ;;  %v202_v6 = vld [vmem:[#allocation2 + $0x70] sm:$0xff] }
  0x9a   : > { %643 = vmatpush.msra.mxu0 %v192_v10  ;;  %666 = vmatpush.msra.mxu1 %v320_v11  ;;  %v330_v7 = vld [vmem:[#allocation2 + $0x470] sm:$0xff] }
  0x9b   : > { %769 = vmatpush.msrb.mxu2 %v291_v14  ;;  %792 = vmatpush.msrb.mxu3 %v419_v15  ;;  %v194_v8 = vld [vmem:[#allocation2 + $0x30] sm:$0xff] }
  0x9c   : > { %720 = vmatpush.msrb.mxu0 %v314_v12  ;;  %743 = vmatpush.msrb.mxu1 %v442_v13  ;;  %v322_v9 = vld [vmem:[#allocation2 + $0x430] sm:$0xff] }
  0x9d   : > { %601 = vmatmul.f32.gmra.mxu2 %v1289_v40  ;;  %624 = vmatmul.f32.gmra.mxu3 %v1292_v41 }
  0x9e   : > { %721 = vmatpush.msrb.mxu0 %v306_v16  ;;  %744 = vmatpush.msrb.mxu1 %v434_v17 }
  0x9f   : > { %770 = vmatpush.msrb.mxu2 %v283_v18  ;;  %793 = vmatpush.msrb.mxu3 %v411_v19 }
  0xa0   : > { %722 = vmatpush.msrb.mxu0 %v298_v20  ;;  %745 = vmatpush.msrb.mxu1 %v426_v21 }
  0xa1   : > { %771 = vmatpush.msrb.mxu2 %v275_v22  ;;  %794 = vmatpush.msrb.mxu3 %v403_v23 }
  0xa2   : > { %723 = vmatpush.msrb.mxu0 %v290_v24  ;;  %746 = vmatpush.msrb.mxu1 %v418_v25 }
  0xa3   : > { %772 = vmatpush.msrb.mxu2 %v267_v26  ;;  %795 = vmatpush.msrb.mxu3 %v395_v27 }
  0xa4   : > { %555 = vmatmul.f32.gmra.mxu0 %v1289_v40  ;;  %578 = vmatmul.f32.gmra.mxu1 %v1292_v41 }
  0xa5   : > { %724 = vmatpush.msrb.mxu0 %v282_v28  ;;  %747 = vmatpush.msrb.mxu1 %v410_v29 }
  0xa6   : > { %773 = vmatpush.msrb.mxu2 %v259_v30  ;;  %796 = vmatpush.msrb.mxu3 %v387_v31 }
  0xa7   : > { %690 = vmatmul.f32.vlgmr.msra.gmra.mxu2 %v1279_v58  ;;  %713 = vmatmul.f32.vlgmr.msra.gmra.mxu3 %v1282_v59 }
  0xa8   : > { %725 = vmatpush.msrb.mxu0 %v274_v32  ;;  %748 = vmatpush.msrb.mxu1 %v402_v33 }
  0xa9   : > { %774 = vmatpush.msrb.mxu2 %v251_v34  ;;  %797 = vmatpush.msrb.mxu3 %v379_v35 }
  0xaa   : > { %726 = vmatpush.msrb.mxu0 %v266_v36  ;;  %749 = vmatpush.msrb.mxu1 %v394_v37 }
  0xab   : > { %775 = vmatpush.msrb.mxu2 %v243_v38  ;;  %798 = vmatpush.msrb.mxu3 %v371_v39 }
  0xac   : > { %727 = vmatpush.msrb.mxu0 %v258_v42  ;;  %750 = vmatpush.msrb.mxu1 %v386_v43 }
  0xad   : > { %776 = vmatpush.msrb.mxu2 %v235_v44  ;;  %799 = vmatpush.msrb.mxu3 %v363_v45 }
  0xae   : > { %644 = vmatmul.f32.vlgmr.msra.gmra.mxu0 %v1279_v58  ;;  %667 = vmatmul.f32.vlgmr.msra.gmra.mxu1 %v1282_v59 }
  0xaf   : > { %728 = vmatpush.msrb.mxu0 %v250_v46  ;;  %751 = vmatpush.msrb.mxu1 %v378_v47 }
  0xb0   : > { %777 = vmatpush.msrb.mxu2 %v227_v48  ;;  %800 = vmatpush.msrb.mxu3 %v355_v49 }
  0xb1   : > { %693 = vmatmul.f32.gmra.mxu2 %v1289_v40  ;;  %716 = vmatmul.f32.gmra.mxu3 %v1292_v41 }
  0xb2   : > { %729 = vmatpush.msrb.mxu0 %v242_v50  ;;  %752 = vmatpush.msrb.mxu1 %v370_v51 }
  0xb3   : > { %778 = vmatpush.msrb.mxu2 %v219_v52  ;;  %801 = vmatpush.msrb.mxu3 %v347_v53 }
  0xb4   : > { %730 = vmatpush.msrb.mxu0 %v234_v54  ;;  %753 = vmatpush.msrb.mxu1 %v362_v55 }
  0xb5   : > { %779 = vmatpush.msrb.mxu2 %v211_v56  ;;  %802 = vmatpush.msrb.mxu3 %v339_v57 }
  0xb6   : > { %731 = vmatpush.msrb.mxu0 %v226_v60  ;;  %754 = vmatpush.msrb.mxu1 %v354_v61 }
  0xb7   : > { %780 = vmatpush.msrb.mxu2 %v203_v62  ;;  %803 = vmatpush.msrb.mxu3 %v331_v63 }
  0xb8   : > { %647 = vmatmul.f32.gmra.mxu0 %v1289_v40  ;;  %670 = vmatmul.f32.gmra.mxu1 %v1292_v41 }
  0xb9   : > { %732 = vmatpush.msrb.mxu0 %v218_v0  ;;  %755 = vmatpush.msrb.mxu1 %v346_v1 }
  0xba   : > { %781 = vmatpush.msrb.mxu2 %v195_v2  ;;  %804 = vmatpush.msrb.mxu3 %v323_v3 }
  0xbb   : > { %782 = vmatmul.f32.vlgmr.msrb.gmra.mxu2 %v1279_v58  ;;  %805 = vmatmul.f32.vlgmr.msrb.gmra.mxu3 %v1282_v59 }
  0xbc   : > { %733 = vmatpush.msrb.mxu0 %v210_v4  ;;  %756 = vmatpush.msrb.mxu1 %v338_v5 }
  0xbe   : > { %734 = vmatpush.msrb.mxu0 %v202_v6  ;;  %757 = vmatpush.msrb.mxu1 %v330_v7 }
  0xc0   : > { %735 = vmatpush.msrb.mxu0 %v194_v8  ;;  %758 = vmatpush.msrb.mxu1 %v322_v9 }
  0xc1   : > { %736 = vmatmul.f32.vlgmr.msrb.gmra.mxu0 %v1279_v58  ;;  %759 = vmatmul.f32.vlgmr.msrb.gmra.mxu1 %v1282_v59 }
  0xc3   : > { %785 = vmatmul.f32.gmra.mxu2 %v1289_v40  ;;  %808 = vmatmul.f32.gmra.mxu3 %v1292_v41 }
  0xc9   : > { %739 = vmatmul.f32.gmra.mxu0 %v1289_v40  ;;  %762 = vmatmul.f32.gmra.mxu1 %v1292_v41 }
  0xef   : > { %v530_v11 = vpop.f32.mrf.mxu3 }
  0xf0   : > { %v507_v10 = vpop.f32.mrf.mxu2 }
  0xf1   : > { %v461_v12 = vpop.f32.mrf.mxu0  ;;  %v531_v14 = vadd.f32 %v530_v11, %v507_v10 }
  0xf2   : > { %v484_v13 = vpop.f32.mrf.mxu1 }
  0xf3   : > { %v485_v15 = vadd.f32 %v484_v13, %v461_v12  ;;  %813 = vst [vmem:[%s1323_s20 + $0x8] sm:$0xff] %v531_v14 }
  0xf5   : > { %812 = vst [vmem:[%s1323_s20] sm:$0xff] %v485_v15 }
 0x109   : > { %v533_v59 = vpop.f32.mrf.mxu3 }
 0x10a   : > { %v510_v58 = vpop.f32.mrf.mxu2 }
 0x10b   : > { %v464_v40 = vpop.f32.mrf.mxu0  ;;  %v487_v41 = vpop.f32.mrf.mxu1  ;;  %v534_v16 = vadd.f32 %v533_v59, %v510_v58 }
 0x10c   : > { %v488_v17 = vadd.f32 %v487_v41, %v464_v40 }
 0x10d   : > { %821 = vst [vmem:[%s1323_s20 + $0x48] sm:$0xff] %v534_v16 }
 0x10e   : > { %820 = vst [vmem:[%s1323_s20 + $0x40] sm:$0xff] %v488_v17 }
 0x114   : > { %v599_v18 = vpop.f32.mrf.mxu2  ;;  %v622_v19 = vpop.f32.mrf.mxu3 }
 0x115   : > { %v623_v20 = vadd.f32 %v622_v19, %v599_v18  ;;  %v553_v21 = vpop.f32.mrf.mxu0  ;;  %v576_v22 = vpop.f32.mrf.mxu1 }
 0x116   : > { %v577_v23 = vadd.f32 %v576_v22, %v553_v21 }
 0x117   : > { %815 = vst [vmem:[%s1323_s20 + $0x18] sm:$0xff] %v623_v20 }
 0x118   : > { %814 = vst [vmem:[%s1323_s20 + $0x10] sm:$0xff] %v577_v23 }
 0x120   : > { %v602_v24 = vpop.f32.mrf.mxu2  ;;  %v625_v25 = vpop.f32.mrf.mxu3 }
 0x121   : > { %v556_v26 = vpop.f32.mrf.mxu0  ;;  %v579_v27 = vpop.f32.mrf.mxu1  ;;  %v626_v28 = vadd.f32 %v625_v25, %v602_v24 }
 0x122   : > { %v580_v29 = vadd.f32 %v579_v27, %v556_v26 }
 0x123   : > { %823 = vst [vmem:[%s1323_s20 + $0x58] sm:$0xff] %v626_v28 }
 0x124   : > { %822 = vst [vmem:[%s1323_s20 + $0x50] sm:$0xff] %v580_v29 }
 0x12a   : > { %v691_v30 = vpop.f32.mrf.mxu2  ;;  %v714_v31 = vpop.f32.mrf.mxu3 }
 0x12b   : > { %v645_v32 = vpop.f32.mrf.mxu0  ;;  %v668_v33 = vpop.f32.mrf.mxu1  ;;  %v715_v34 = vadd.f32 %v714_v31, %v691_v30 }
 0x12c   : > { %v669_v35 = vadd.f32 %v668_v33, %v645_v32 }
 0x12d   : > { %817 = vst [vmem:[%s1323_s20 + $0x28] sm:$0xff] %v715_v34 }
 0x12e   : > { %816 = vst [vmem:[%s1323_s20 + $0x20] sm:$0xff] %v669_v35 }
 0x134   : > { %v694_v36 = vpop.f32.mrf.mxu2  ;;  %v717_v37 = vpop.f32.mrf.mxu3 }
 0x135   : > { %v648_v38 = vpop.f32.mrf.mxu0  ;;  %v671_v39 = vpop.f32.mrf.mxu1  ;;  %v718_v42 = vadd.f32 %v717_v37, %v694_v36 }
 0x136   : > { %v672_v43 = vadd.f32 %v671_v39, %v648_v38 }
 0x137   : > { %825 = vst [vmem:[%s1323_s20 + $0x68] sm:$0xff] %v718_v42 }
 0x138   : > { %824 = vst [vmem:[%s1323_s20 + $0x60] sm:$0xff] %v672_v43 }
 0x13e   : > { %v737_v44 = vpop.f32.mrf.mxu0  ;;  %v760_v45 = vpop.f32.mrf.mxu1 }
 0x13f   : > { %v761_v46 = vadd.f32 %v760_v45, %v737_v44  ;;  %v783_v47 = vpop.f32.mrf.mxu2  ;;  %v806_v48 = vpop.f32.mrf.mxu3 }
 0x140   : > { %v807_v49 = vadd.f32 %v806_v48, %v783_v47 }
 0x141   : > { %818 = vst [vmem:[%s1323_s20 + $0x30] sm:$0xff] %v761_v46 }
 0x142   : > { %819 = vst [vmem:[%s1323_s20 + $0x38] sm:$0xff] %v807_v49 }
 0x146   : > { %v740_v50 = vpop.f32.mrf.mxu0  ;;  %v763_v51 = vpop.f32.mrf.mxu1 }
 0x147   : > { %v764_v52 = vadd.f32 %v763_v51, %v740_v50  ;;  %v786_v53 = vpop.f32.mrf.mxu2  ;;  %v809_v54 = vpop.f32.mrf.mxu3 }
 0x148   : > { %v810_v55 = vadd.f32 %v809_v54, %v786_v53 }
 0x149   : > { %826 = vst [vmem:[%s1323_s20 + $0x70] sm:$0xff] %v764_v52 }
 0x14a   : > { %827 = vst [vmem:[%s1323_s20 + $0x78] sm:$0xff] %v810_v55 }
 0x14b   : > { %1102 = shalt.err (!%p1099_p10)
}
 0x14c   : > { %s1152_s5 = smov 1024   ;;  %s1153_s6 = smov 64  }
 0x14d   : > { %958 = dma.vmem_to_hbm [thread:$0]  (%p1236_p7), %s843_s21, 2048, %s845_s22, %s829_s13, %s1152_s5, %s1152_s5, %s1153_s6  }
 0x14e PF: > { %s859_s7 = sand.u32 1, %s1133_s9   ;;  %p1383_p12 = scmp.ge.s32.totalorder %s1145_s12, 2 }
 0x14f   : > { %s860_s14 = scalar_lea.sflag [#allocation4], %s859_s7 }
 0x150   : > { %p969_p13 = pnand %p1383_p12, %p1204_p6 }
 0x152   : > { %p970_p0 = pneg %p969_p13 }
 0x154   : > { %1128 = dma.done.wait (%p970_p0), %s860_s14, 2048  }
 0x155   : > { %1130 = vsyncadd (%p970_p0), %s860_s14, 4294965248  ;;  %p16_p3 = scmp.ge.s32.totalorder %s1222_s23, 4   ;;  %s1384_s9 = smov %s1137_s10 }
 0x156   : > { %s1385_s10 = smov %s1141_s11  ;;  %s1386_s11 = smov %s1232_s28 }
 0x157   : > { %s1387_s12 = smov %s1222_s23  ;;  %18 = sbr.rel (!%p16_p3) target bundleno = 6 (0x6), region = 78 }
 0x15c   :  { %866 = vsyncpa [#allocation3], 1 }
 0x15d   :  { %868 = vsyncpa [#allocation3 + $0x1], 1 }
 0x15e   :  { %869 = vsyncpa [#allocation6], 1 }
 0x15f   :  { %871 = vsyncpa [#allocation6 + $0x1], 1 }
 0x160   :  { %872 = vsyncpa [#allocation4], 1 }
 0x161   :  { %874 = vsyncpa [#allocation4 + $0x1], 1 }

</bundles_post_ra>
